<compile_context>
chip_gen: v5e
topology: v5e:2x2
jax: 0.10.0
libtpu: 0.0.40
codegen_flags: <defaults>
</compile_context>

<pallas_src>
import jax
import jax.numpy as jnp
from jax.experimental import pallas as pl
from jax.experimental.pallas import tpu as pltpu

NEG = -1e30  # "minus infinity" that stays finite under (*0), exp() and bf16 storage


def _round_up(x, m):
    return ((x + m - 1) // m) * m


def _vmem_capacity_bytes():
    # Per-generation VMEM (v5e/v6e: 128 MiB, v7x: 64 MiB).  Conservative fallback.
    try:
        cap = getattr(pltpu.get_tpu_info(), "vmem_capacity_bytes", None)
        if cap:
            return int(cap)
    except Exception:
        pass
    return 64 * 1024 * 1024


def _pick_time_tile(T, D, Hp, Cp, budget):
    # Largest time tile dividing T that fits the per-step VMEM budget.  The FFN grid
    # is (B, T//Tt), so even the full-T fallback keeps >= B pipelined / megacore-
    # splittable grid steps (the old flattened-row "collapse to one block" mode is gone).
    for cand in (1024, 512, 256, 128, 64, 32, 16, 8):
        if cand <= T and T % cand == 0:
            need = (2 * cand * D * 2                       # double-buffered x tiles (bf16)
                    + 2 * cand * Cp * 2                    # double-buffered logits out (bf16)
                    + 2 * (D * Hp + Hp * Cp) * 2           # resident weights (bf16, 2 bufs)
                    + 2 * (Hp + Cp) * 4                    # biases (f32)
                    + cand * Hp * 4 + cand * Cp * 4)       # f32 intermediates
            if need <= budget:
                return cand
    return T


def _pick_crf_batch_tile(B, T, Cp, budget):
    # Largest multiple-of-8 batch tile that fits VMEM; prefer >=2 tiles (v7x megacore).
    if B % 8 != 0:
        return B                                          # block must equal the full dim
    def fits(bt):
        streamed = 2 * 2 * T * bt * Cp * 2                # logits + one-hots, 2 bufs, bf16
        temps = 4 * T * bt * Cp * 2                       # in-kernel elementwise temporaries
        resident = 2 * Cp * Cp * 4                        # exp(transitions)
        return streamed + temps + resident <= budget
    cands = [bt for bt in range(8, min(B, 128) + 1, 8) if B % bt == 0 and fits(bt)]
    if not cands:
        return 8
    multi = [bt for bt in cands if B // bt >= 2]
    return max(multi) if multi else max(cands)


# ---------------------------------------------------------------------------
# Kernel 1: token-level 2-layer FFN (Linears) -> time-major, lane-dense bf16 logits.
# ---------------------------------------------------------------------------
def ffn_kernel(x_ref, w1_ref, b1_ref, w2_ref, b2_ref, out_ref):
    # x: (1, Tt, D) bf16, w1: (D, Hp) bf16, w2: (Hp, Cp) bf16, biases f32.
    x = x_ref[0]                                               # (Tt, D)
    h = jnp.dot(x, w1_ref[...], preferred_element_type=jnp.float32)
    h = jnp.maximum(h + b1_ref[...], 0.0)                      # bias + ReLU in f32 (v5e-safe)
    # dropout is identity at inference time
    logits = jnp.dot(h.astype(jnp.bfloat16), w2_ref[...],
                     preferred_element_type=jnp.float32) + b2_ref[...]
    out_ref[...] = logits.astype(jnp.bfloat16)                 # (Tt, Cp) time-major slab


def entity_label_ffn(x, w1p, b1p, w2p, b2p, Tt, vmem_limit):
    B, T, D = x.shape
    Hp = w1p.shape[1]
    Cp = w2p.shape[1]
    # Output is (T, B*Cp): column slab b holds batch element b's logits, time-major.
    return pl.pallas_call(
        ffn_kernel,
        out_shape=jax.ShapeDtypeStruct((T, B * Cp), jnp.bfloat16),
        grid=(B, T // Tt),
        in_specs=[
            pl.BlockSpec((1, Tt, D), lambda b, t: (b, t, 0)),  # streamed activation tiles
            pl.BlockSpec((D, Hp), lambda b, t: (0, 0)),        # resident weights
            pl.BlockSpec((1, Hp), lambda b, t: (0, 0)),
            pl.BlockSpec((Hp, Cp), lambda b, t: (0, 0)),
            pl.BlockSpec((1, Cp), lambda b, t: (0, 0)),
        ],
        out_specs=pl.BlockSpec((Tt, Cp), lambda b, t: (t, b)),
        compiler_params=pltpu.CompilerParams(
            dimension_semantics=("parallel", "parallel"),
            vmem_limit_bytes=vmem_limit),
    )(x, w1p, b1p, w2p, b2p)


# ---------------------------------------------------------------------------
# Kernel 2: CRF — hoisted gold unary score + forward-algorithm log partition.
# The fori_loop carries ONLY alphas; its per-step body is the recursion matmul
#   new_a = logit + m + log(exp(a - m) @ exp(trans))
# plus the carry-through mask derived from the one-hot row sum.
# ---------------------------------------------------------------------------
def crf_kernel(logits_ref, oh_ref, etrans_ref, out_ref):
    # logits_ref: (T, Bt, Cp) bf16, padded label columns ~= -1e30
    # oh_ref:     (T, Bt, Cp) bf16, one-hot(gold tag) with padded tokens = all-zero row
    # etrans_ref: (Cp, Cp)    f32,  exp(transitions), padded rows/cols = 0
    T = logits_ref.shape[0]
    etrans = etrans_ref[...]

    # --- hoisted gold unary score: one vectorized multiply + reduce, off the serial path
    prod = (logits_ref[...] * oh_ref[...]).astype(jnp.float32)        # (T, Bt, Cp)
    unary = jnp.sum(jnp.sum(prod, axis=2, keepdims=True), axis=0)     # (Bt, 1)

    alphas0 = logits_ref[0].astype(jnp.float32)                       # (Bt, Cp)

    def step(t, alphas):
        lg = logits_ref[t].astype(jnp.float32)                        # (Bt, Cp)
        vl = jnp.sum(oh_ref[t].astype(jnp.float32), axis=1, keepdims=True)  # 1=real, 0=pad
        m = jnp.max(alphas, axis=1, keepdims=True)
        s = jnp.dot(jnp.exp(alphas - m), etrans, preferred_element_type=jnp.float32)
        new_alphas = lg + m + jnp.log(jnp.maximum(s, 1e-30))
        return jnp.where(vl > 0.0, new_alphas, alphas)                # carry through padding

    alphas = jax.lax.fori_loop(1, T, step, alphas0)

    m = jnp.max(alphas, axis=1, keepdims=True)
    log_norm = m + jnp.log(jnp.sum(jnp.exp(alphas - m), axis=1, keepdims=True))
    out_ref[...] = unary - log_norm                                   # (Bt, 1)


def crf_unary_minus_lognorm(logits_tm, oh_tm, etrans, Bt, vmem_limit):
    T, B, Cp = logits_tm.shape
    return pl.pallas_call(
        crf_kernel,
        out_shape=jax.ShapeDtypeStruct((B, 1), jnp.float32),
        grid=(B // Bt,),
        in_specs=[
            pl.BlockSpec((T, Bt, Cp), lambda b: (0, b, 0)),
            pl.BlockSpec((T, Bt, Cp), lambda b: (0, b, 0)),
            pl.BlockSpec((Cp, Cp), lambda b: (0, 0)),
        ],
        out_specs=pl.BlockSpec((Bt, 1), lambda b: (b, 0)),
        compiler_params=pltpu.CompilerParams(
            dimension_semantics=("parallel",),
            vmem_limit_bytes=vmem_limit),
    )(logits_tm, oh_tm, etrans)


# ---------------------------------------------------------------------------
# NERClassifier.forward
# ---------------------------------------------------------------------------
def ner_classifier_forward(word_reprs, word_mask, entity_label_idxs, params):
    B, T, D = word_reprs.shape
    H = params["w1"].shape[1]
    C = params["w2"].shape[1]
    Hp = max(128, _round_up(H, 128))            # lane-dense padded hidden dim
    Cp = max(128, _round_up(C, 128))            # lane-dense padded label dim

    cap = _vmem_capacity_bytes()
    budget = int(cap * 0.55)                    # tile-picking budget
    vmem_limit = int(cap * 0.70)                # explicit scoped-VMEM request

    # --- pad / cast parameters once (hidden -> Hp, labels -> Cp, bf16 MXU weights) ---
    w1p = jnp.zeros((D, Hp), jnp.float32).at[:, :H].set(params["w1"]).astype(jnp.bfloat16)
    b1p = jnp.zeros((1, Hp), jnp.float32).at[:, :H].set(params["b1"].reshape(1, H))
    w2p = jnp.zeros((Hp, Cp), jnp.float32).at[:H, :C].set(params["w2"]).astype(jnp.bfloat16)
    b2p = jnp.full((1, Cp), NEG, jnp.float32).at[:, :C].set(params["b2"].reshape(1, C))
    trans = params["transitions"].astype(jnp.float32)
    etrans = jnp.exp(jnp.full((Cp, Cp), NEG, jnp.float32).at[:C, :C].set(trans))
    trans_z = jnp.zeros((Cp, Cp), jnp.float32).at[:C, :C].set(trans)

    # --- kernel 1: token FFN, emitted time-major bf16 (no XLA transpose of logits) ---
    Tt = _pick_time_tile(T, D, Hp, Cp, budget)
    x = word_reprs.astype(jnp.bfloat16)
    logits_flat = entity_label_ffn(x, w1p, b1p, w2p, b2p, Tt, vmem_limit)  # (T, B*Cp)
    logits_tm = logits_flat.reshape(T, B, Cp)    # free row-major split of the minor dim

    # --- gold one-hots, time-major (valid folded in: padded token -> all-zero row) ---
    # NOTE: gold tags for *valid* tokens are assumed to lie in [0, n_labels); an
    # out-of-range valid tag would silently produce a zero row (unlike a gather).
    # alphas is seeded from t=0 unconditionally (first token assumed non-padding),
    # matching the reference CRF.
    valid = (word_mask == 0)
    tags_tm = jnp.where(valid, entity_label_idxs, -1).astype(jnp.int32).T   # (T, B), tiny
    oh_tm = jax.nn.one_hot(tags_tm, Cp, dtype=jnp.bfloat16)                 # (T, B, Cp)

    # --- gold transition score: depends only on tags & transitions, so it is hoisted
    #     entirely out of the serial CRF kernel as one vectorized einsum. ---
    oh_f = oh_tm.astype(jnp.float32)
    binary = jnp.einsum("tbc,cd,tbd->b", oh_f[:-1], trans_z, oh_f[1:])      # (B,)

    # --- kernel 2: hoisted unary gold score + forward-algorithm log partition ---
    Bt = _pick_crf_batch_tile(B, T, Cp, budget)
    un_ln = crf_unary_minus_lognorm(logits_tm, oh_tm, etrans, Bt, vmem_limit)  # (B, 1)

    ll = un_ln[:, 0] + binary
    return -jnp.sum(ll) / B                      # CRFLoss(batch_average=True)


# ---------------------------------------------------------------------------
# Pure-JAX reference (mirrors the kernel's bf16/f32 mixed precision, including the
# bf16 inter-kernel logits; the CRF is the standard logsumexp formulation,
# independently checking the matmul-based forward algorithm + padded-label handling).
# ---------------------------------------------------------------------------
def reference_forward(word_reprs, word_mask, tags, params):
    xb = word_reprs.astype(jnp.bfloat16)
    h = jnp.dot(xb, params["w1"].astype(jnp.bfloat16),
                preferred_element_type=jnp.float32) + params["b1"]
    h = jnp.maximum(h, 0.0)
    logits = jnp.dot(h.astype(jnp.bfloat16), params["w2"].astype(jnp.bfloat16),
                     preferred_element_type=jnp.float32) + params["b2"]
    logits = logits.astype(jnp.bfloat16).astype(jnp.float32)   # mirror bf16 logits storage
    trans = params["transitions"]
    B, T, _ = logits.shape
    valid = (word_mask == 0).astype(jnp.float32)

    unary = jnp.sum(
        jnp.take_along_axis(logits, tags[:, :, None], axis=2)[:, :, 0] * valid, axis=1)
    binary = jnp.sum(trans[tags[:, :-1], tags[:, 1:]] * valid[:, 1:], axis=1)

    alphas = logits[:, 0, :]
    for t in range(1, T):
        ts = alphas[:, :, None] + trans[None, :, :]
        new_alphas = logits[:, t, :] + jax.scipy.special.logsumexp(ts, axis=1)
        alphas = jnp.where((word_mask[:, t] == 1)[:, None], alphas, new_alphas)
    log_norm = jax.scipy.special.logsumexp(alphas, axis=1)

    ll = unary + binary - log_norm
    return -jnp.sum(ll) / B


if __name__ == "__main__":
    # Small deterministic shapes consistent with the module:
    # B = batch, T = seq len, D = xlmr_dim (scaled down), H = hidden_num, C = labels.
    B, T, D, H, C = 2, 8, 32, 16, 9

    key = jax.random.PRNGKey(0)
    k1, k2, k3, k4, k5, k6, k7 = jax.random.split(key, 7)

    params = {
        "w1": 0.1 * jax.random.normal(k1, (D, H), jnp.float32),
        "b1": 0.1 * jax.random.normal(k2, (1, H), jnp.float32),
        "w2": 0.1 * jax.random.normal(k3, (H, C), jnp.float32),
        "b2": 0.1 * jax.random.normal(k4, (1, C), jnp.float32),
        # CRFLoss initializes transitions to zeros; small random values exercise the
        # transition / forward-algorithm path deterministically.
        "transitions": 0.05 * jax.random.normal(k5, (C, C), jnp.float32),
    }

    word_reprs = jax.random.normal(k6, (B, T, D), jnp.float32)
    entity_label_idxs = jax.random.randint(k7, (B, T), 0, C, jnp.int32)
    # word_mask: 1 = padding (second sentence has 3 padded tokens)
    word_mask = jnp.array([[0, 0, 0, 0, 0, 0, 0, 0],
                           [0, 0, 0, 0, 0, 1, 1, 1]], dtype=jnp.int32)

    loss = ner_classifier_forward(word_reprs, word_mask, entity_label_idxs, params)
    jax.block_until_ready(loss)

    loss_ref = reference_forward(word_reprs, word_mask, entity_label_idxs, params)
    if not jnp.allclose(loss, loss_ref, rtol=2e-3, atol=2e-3):
        raise AssertionError(f"mismatch: pallas={loss} ref={loss_ref}")

    # TODO(synk): predict() (viterbi_decode on host numpy), pretrained checkpoint
    # loading and train-mode dropout are not part of the forward hot path and are
    # not implemented.
    print("KERNEL_OK")
</pallas_src>

<mosaic_0001>
module attributes {stable_mosaic.version = 11 : i64} {
  func.func @ffn_kernel(%arg0: i32, %arg1: i32, %arg2: memref<1x8x32xbf16, #tpu.memory_space<vmem>>, %arg3: memref<32x128xbf16, #tpu.memory_space<vmem>>, %arg4: memref<1x128xf32, #tpu.memory_space<vmem>>, %arg5: memref<128x128xbf16, #tpu.memory_space<vmem>>, %arg6: memref<1x128xf32, #tpu.memory_space<vmem>>, %arg7: memref<8x128xbf16, #tpu.memory_space<vmem>>) attributes {dimension_semantics = [#tpu.dimension_semantics<parallel>, #tpu.dimension_semantics<parallel>], iteration_bounds = array<i64: 2, 1>, scalar_prefetch = 0 : i64, scratch_operands = 0 : i64, tpu.core_type = #tpu.core_type<tc>, window_params = [{transform_indices = @transform_0, window_bounds = array<i64: 1, 8, 32>}, {pipeline_mode = #tpu.pipeline_mode<synchronous>, transform_indices = @transform_1, window_bounds = array<i64: 32, 128>}, {pipeline_mode = #tpu.pipeline_mode<synchronous>, transform_indices = @transform_2, window_bounds = array<i64: 1, 128>}, {pipeline_mode = #tpu.pipeline_mode<synchronous>, transform_indices = @transform_3, window_bounds = array<i64: 128, 128>}, {pipeline_mode = #tpu.pipeline_mode<synchronous>, transform_indices = @transform_4, window_bounds = array<i64: 1, 128>}, {transform_indices = @transform_5, window_bounds = array<i64: 8, 128>}]} {
    %c0 = arith.constant 0 : index
    %c0_0 = arith.constant 0 : index
    %c0_1 = arith.constant 0 : index
    %0 = vector.load %arg2[%c0, %c0_0, %c0_1] : memref<1x8x32xbf16, #tpu.memory_space<vmem>>, vector<1x8x32xbf16>
    %1 = vector.shape_cast %0 : vector<1x8x32xbf16> to vector<8x32xbf16>
    %c0_2 = arith.constant 0 : index
    %c0_3 = arith.constant 0 : index
    %2 = vector.load %arg3[%c0_2, %c0_3] : memref<32x128xbf16, #tpu.memory_space<vmem>>, vector<32x128xbf16>
    %cst = arith.constant dense<0.000000e+00> : vector<8x128xf32>
    %3 = tpu.matmul %1, %2, %cst {dimension_numbers = #tpu.dot_dimension_numbers<[1], [0], [0], [1], [0, 0, 1, 1], [], []>} : vector<8x32xbf16>, vector<32x128xbf16>, vector<8x128xf32> -> vector<8x128xf32>
    %c0_4 = arith.constant 0 : index
    %c0_5 = arith.constant 0 : index
    %4 = vector.load %arg4[%c0_4, %c0_5] : memref<1x128xf32, #tpu.memory_space<vmem>>, vector<1x128xf32>
    %5 = vector.broadcast %4 : vector<1x128xf32> to vector<8x128xf32>
    %6 = arith.addf %3, %5 : vector<8x128xf32>
    %cst_6 = arith.constant 0.000000e+00 : f32
    %7 = vector.broadcast %cst_6 : f32 to vector<8x128xf32>
    %8 = arith.maximumf %6, %7 : vector<8x128xf32>
    %9 = arith.truncf %8 : vector<8x128xf32> to vector<8x128xbf16>
    %c0_7 = arith.constant 0 : index
    %c0_8 = arith.constant 0 : index
    %10 = vector.load %arg5[%c0_7, %c0_8] : memref<128x128xbf16, #tpu.memory_space<vmem>>, vector<128x128xbf16>
    %cst_9 = arith.constant dense<0.000000e+00> : vector<8x128xf32>
    %11 = tpu.matmul %9, %10, %cst_9 {dimension_numbers = #tpu.dot_dimension_numbers<[1], [0], [0], [1], [0, 0, 1, 1], [], []>} : vector<8x128xbf16>, vector<128x128xbf16>, vector<8x128xf32> -> vector<8x128xf32>
    %c0_10 = arith.constant 0 : index
    %c0_11 = arith.constant 0 : index
    %12 = vector.load %arg6[%c0_10, %c0_11] : memref<1x128xf32, #tpu.memory_space<vmem>>, vector<1x128xf32>
    %13 = vector.broadcast %12 : vector<1x128xf32> to vector<8x128xf32>
    %14 = arith.addf %11, %13 : vector<8x128xf32>
    %15 = arith.truncf %14 : vector<8x128xf32> to vector<8x128xbf16>
    %c0_12 = arith.constant 0 : index
    %c0_13 = arith.constant 0 : index
    %16 = vector.load %arg7[%c0_12, %c0_13] : memref<8x128xbf16, #tpu.memory_space<vmem>>, vector<8x128xbf16>
    tpu.vector_store %arg7[%c0_12, %c0_13], %15 {strides = array<i32>} : memref<8x128xbf16, #tpu.memory_space<vmem>>, vector<8x128xbf16>,
    return
  }
  func.func @transform_0(%arg0: i32, %arg1: i32) -> (i32, i32, i32) {
    %c0_i32 = arith.constant 0 : i32
    %c0_i32_0 = arith.constant 0 : i32
    return %arg0, %arg1, %c0_i32 : i32, i32, i32
  }
  func.func @transform_1(%arg0: i32, %arg1: i32) -> (i32, i32) {
    %c0_i32 = arith.constant 0 : i32
    %c0_i32_0 = arith.constant 0 : i32
    %c0_i32_1 = arith.constant 0 : i32
    return %c0_i32, %c0_i32_0 : i32, i32
  }
  func.func @transform_2(%arg0: i32, %arg1: i32) -> (i32, i32) {
    %c0_i32 = arith.constant 0 : i32
    %c0_i32_0 = arith.constant 0 : i32
    %c0_i32_1 = arith.constant 0 : i32
    return %c0_i32, %c0_i32_0 : i32, i32
  }
  func.func @transform_3(%arg0: i32, %arg1: i32) -> (i32, i32) {
    %c0_i32 = arith.constant 0 : i32
    %c0_i32_0 = arith.constant 0 : i32
    %c0_i32_1 = arith.constant 0 : i32
    return %c0_i32, %c0_i32_0 : i32, i32
  }
  func.func @transform_4(%arg0: i32, %arg1: i32) -> (i32, i32) {
    %c0_i32 = arith.constant 0 : i32
    %c0_i32_0 = arith.constant 0 : i32
    %c0_i32_1 = arith.constant 0 : i32
    return %c0_i32, %c0_i32_0 : i32, i32
  }
  func.func @transform_5(%arg0: i32, %arg1: i32) -> (i32, i32) {
    %c0_i32 = arith.constant 0 : i32
    return %arg1, %arg0 : i32, i32
  }
}

</mosaic_0001>

<bundles_post_ra>
// kernel: tpu_custom_call.1
= control target key start
LH: loop header
LB: loop body
LE: loop exit
PB: predicated region body
PF: predicated region fallthrough
CT: control target
= control target key end

     0   :  { %10 = vsyncpa [#allocation3], 0  ;;  %s1055_s0 = inlined_call_operand.hbm [shape: bf16[2,8,32], index: 0, kind: input, shape index: {}]   ;;  %s1056_s1 = inlined_call_operand.hbm [shape: bf16[32,128], index: 1, kind: input, shape index: {}]   ;;  %s1057_s2 = inlined_call_operand.vmem [shape: f32[1,128], index: 2, kind: input, shape index: {}]   ;;  %s1058_s3 = inlined_call_operand.hbm [shape: bf16[128,128], index: 3, kind: input, shape index: {}]   ;;  %s1059_s4 = inlined_call_operand.vmem [shape: f32[1,128], index: 4, kind: input, shape index: {}]   ;;  %s1060_s5 = inlined_call_operand.hbm [shape: bf16[8,256], index: 5, kind: output, shape index: {}]  }
   0x1   :  { %12 = vsyncpa [#allocation3 + $0x1], 0 }
   0x2   :  { %13 = vsyncpa [#allocation6], 0 }
   0x3   :  { %14 = vsyncpa [#allocation4], 0 }
   0x4   :  { %16 = vsyncpa [#allocation4 + $0x1], 0  ;;  %s901_s18 = smov 0   ;;  %s903_s19 = smov 0  }
   0x5   :  { %s905_s20 = smov 0   ;;  %s907_s21 = smov 0  }
   0x6   :  { %s909_s22 = smov 0   ;;  %s911_s23 = smov 0  }
   0x7 LB: > { %s534_s24 = sadd.s32 4294967295, %s865_s23   ;;  %p536_p0 = scmp.ge.s32.totalorder %s865_s23, 1  ;;  %s865_s23 = sphi %s911_s23, %s22_s23   ;;  %s861_s22 = sphi %s909_s22, %s1070_s22   ;;  %s857_s21 = sphi %s907_s21, %s1069_s21   ;;  %s853_s20 = sphi %s905_s20, %s1068_s20   ;;  %s849_s19 = sphi %s903_s19, %s1067_s19   ;;  %s845_s18 = sphi %s901_s18, %s1066_s18  }
   0x8   : > { %p935_p1 = scmp.eq.s32.totalorder %s534_s24, 0  ;;  %p179_p2 = scmp.lt.s32.totalorder %s865_s23, 3 }
   0x9   : > { %s190_s28 = sshll.u32 %s1056_s1, 4  ;;  %s867_s30 = smov [#allocation5]   ;;  %s191_s28 = int_to_ptr.hbm [resolvable:$true] %s190_s28 }
   0xa   : > { %p943_p3 = pnand %p536_p0, %p179_p2  ;;  %s192_s6 = sshll.u32 %s867_s30, 4  ;;  %s193_s6 = int_to_ptr.vmem [resolvable:$true] %s192_s6 }
   0xb   : > { %p539_p6 = scmp.ge.s32.totalorder %s865_s23, 2  ;;  %s207_s9 = sshll.u32 %s1058_s3, 4  ;;  %s208_s9 = int_to_ptr.hbm [resolvable:$true] %s207_s9 }
   0xc   : > { %p614_p4 = pneg %p943_p3  ;;  %s868_s10 = smov 64  }
   0xd   : > { %s869_s11 = smov 4   ;;  %s870_s12 = smov [#allocation7]  }
   0xe   : > { %p615_p5 = pnand %p614_p4, %p935_p1  ;;  %s209_s13 = sshll.u32 %s870_s12, 4  ;;  %s210_s13 = int_to_ptr.vmem [resolvable:$true] %s209_s13 }
   0xf   : > { %s34_s14 = sadd.s32 1, %s861_s22  ;;  %s535_s15 = sadd.s32 4294967294, %s865_s23  }
  0x10   : > { %617 = dma.hbm_to_vmem [thread:$0]  (!%p615_p5), %s191_s28, 256, %s193_s6, [#allocation6], %s868_s10, %s868_s10, %s869_s11  }
  0x11   : > { %620 = dma.hbm_to_vmem [thread:$0]  (!%p615_p5), %s208_s9, 1024, %s210_s13, [#allocation6], %s868_s10, %s868_s10, %s869_s11  }
  0x12   : > { %p36_p7 = scmp.ge.s32.totalorder %s34_s14, 2  ;;  %s43_s16 = sadd.s32 1, %s853_s20 }
  0x13   : > { %p50_p8 = scmp.ne.s32.totalorder %s853_s20, %s849_s19  ;;  %p51_p9 = scmp.eq.s32.totalorder %s865_s23, 0 }
  0x14   : > { %s1072_s14 = smov (%p36_p7, %s34_s14), 0  ;;  %p56_p10 = scmp.ne.s32.totalorder %s849_s19, %s845_s18 }
  0x15   : > { %s38_s17 = ssub.s32 %s861_s22, %s1072_s14  ;;  %p166_p11 = scmp.eq.s32.totalorder %s534_s24, 1 }
  0x16   : > { %p41_p12 = scmp.eq.s32.totalorder %s38_s17, 0  ;;  %p971_p13 = por %p935_p1, %p56_p10 }
  0x17   : > { %p975_p0 = por %p166_p11, %p50_p8  ;;  %p172_p2 = scmp.eq.s32.totalorder %s535_s15, 1 }
  0x18   : > { %s980_s28 = scalar_select %p41_p12, %s853_s20, %s43_s16  }
  0x19   : > { %p52_p4 = por %p51_p9, %p50_p8  ;;  %p982_p5 = por %p172_p2, %p56_p10 }
  0x1a   : > { %s226_s6 = sand.u32 1, %s853_s20   ;;  %s541_s24 = sshll.u32 %s861_s22, 2 }
  0x1b   : > { %p631_p7 = scmp.lt.s32.totalorder %s865_s23, 2  ;;  %s540_s7 = sshll.u32 %s226_s6, 2 }
  0x1c   : > { %s235_s10 = scalar_lea.hbm %s1055_s0, %s541_s24  ;;  %s230_s12 = scalar_lea.vmem [#allocation2], %s540_s7 }
  0x1d   : > { %s237_s11 = sshll.u32 %s235_s10, 4  ;;  %s239_s13 = sshll.u32 %s230_s12, 4  ;;  %s238_s11 = int_to_ptr.hbm [resolvable:$true] %s237_s11  ;;  %s240_s13 = int_to_ptr.vmem [resolvable:$true] %s239_s13 }
  0x1e   : > { %p622_p11 = pnand %p631_p7, %p52_p4  ;;  %s227_s15 = scalar_lea.sflag [#allocation3], %s226_s6 }
  0x1f   : > { %248 = sbr.rel (%p943_p3) target bundleno = 313 (0x139), region = 40  ;;  %s995_s16 = sand.u32 (!%p943_p3), 1, %s849_s19  }
  0x20   : > { %624 = dma.hbm_to_vmem [thread:$0]  (!%p622_p11), %s238_s11, 64, %s240_s13, %s227_s15  }
  0x21   : > { %s543_s17 = sshll.u32 (!%p943_p3), %s995_s16, 2  ;;  %s251_s24 = scalar_lea.sflag (!%p943_p3), [#allocation3], %s995_s16 }
  0x22   : > { %s254_s7 = scalar_lea.vmem (!%p943_p3), [#allocation2], %s543_s17 }
  0x24   : > { %832 = dma.done.wait (%p971_p13), %s251_s24, 64  }
  0x25   : > { %834 = vsyncadd (%p971_p13), %s251_s24, 4294967232 }
  0x26   : > { %836 = dma.done.wait (%p935_p1), [#allocation6], 1280  }
  0x27   : > { %838 = vsyncadd (%p935_p1), [#allocation6], 4294966016  ;;  %v593_v0 = vld [vmem:[#allocation5 + $0x8] sm:$0xff]  ;;  %v592_v2 = vld [vmem:[#allocation5] sm:$0xff]  ;;  %vm314_vm0 = vcmask 261120   ;;  %s589_s26 = sshll.u32 %s857_s21, 2 }
  0x28   : > { %v601_v1 = vld [vmem:[#allocation7 + $0x38] sm:$0xff]  ;;  %324 = vmatpush.bf16.msra.mxu0 %v593_v0  ;;  %v600_v3 = vld [vmem:[#allocation7 + $0x30] sm:$0xff]  ;;  %v293_v4 = vld [vmem:[%s254_s7] sm:$0xf]  ;;  %s429_s11 = scalar_lea.hbm %s1060_s5, %s589_s26  ;;  %s291_s12 = scalar_lea.vmem [#allocation8], %s543_s17 }
  0x29   : > { %401 = vmatpush.bf16.msra.mxu1 %v601_v1  ;;  %v599_v5 = vld [vmem:[#allocation7 + $0x28] sm:$0xff]  ;;  %v598_v6 = vld [vmem:[#allocation7 + $0x20] sm:$0xff]  ;;  %v597_v7 = vld [vmem:[#allocation7 + $0x18] sm:$0xff]  ;;  %s431_s13 = sshll.u32 %s291_s12, 4  ;;  %s433_s15 = sshll.u32 %s429_s11, 4  ;;  %s432_s13 = int_to_ptr.vmem [resolvable:$true] %s431_s13  ;;  %s434_s15 = int_to_ptr.hbm [resolvable:$true] %s433_s15 }
  0x2a   : > { %v596_v8 = vld [vmem:[#allocation7 + $0x10] sm:$0xff]  ;;  %v595_v9 = vld [vmem:[#allocation7 + $0x8] sm:$0xff]  ;;  %v594_v10 = vld [vmem:[#allocation7] sm:$0xff]  ;;  %s417_s21 = scalar_lea.sflag [#allocation4], %s995_s16  ;;  %s793_s24 = sshra.s32 %s434_s15, 4  ;;  %s794_s24 = int_to_ptr.hbm [resolvable:$true] %s793_s24 }
  0x2b   : > { %v687_v11 = vld [vmem:[%s1057_s2] ss:$0 sm:$0xff]  ;;  %s795_s7 = scalar_lea.hbm %s794_s24, 4  ;;  %s799_s26 = scalar_lea.hbm %s1060_s5, 8 }
  0x2c   : > { %325 = vmatpush.bf16.msra.mxu0 %v592_v2  ;;  %v688_v17 = vld [vmem:[%s1059_s4] ss:$0 sm:$0xff]  ;;  %p796_p1 = scmp.ne.s32.totalorder %s794_s24, %s795_s7  ;;  %p800_p9 = scmp.lt.s32.totalorder %s794_s24, %s1060_s5 }
  0x2d   : > { %402 = vmatpush.bf16.msra.mxu1 %v600_v3  ;;  %p801_p10 = scmp.lt.s32.totalorder %s799_s26, %s795_s7 }
  0x2e   : > { %p797_p3 = pnand %p796_p1, %p975_p0 }
  0x2f   : > { %555 = vmatmul.msk.bf16.vlgmr.msra.gmra.mxu0 %vm314_vm0, %v293_v4  ;;  %p802_p12 = por %p801_p10, %p800_p9 }
  0x30   : > { %p798_p8 = pneg %p797_p3 }
  0x31   : > { %403 = vmatpush.bf16.msra.mxu1 %v599_v5 }
  0x32   : > { %p803_p13 = pnand %p802_p12, %p798_p8 }
  0x35   : > { %404 = vmatpush.bf16.msra.mxu1 %v598_v6 }
  0x39   : > { %405 = vmatpush.bf16.msra.mxu1 %v597_v7 }
  0x3d   : > { %406 = vmatpush.bf16.msra.mxu1 %v596_v8 }
  0x41   : > { %407 = vmatpush.bf16.msra.mxu1 %v595_v9 }
  0x45   : > { %408 = vmatpush.bf16.msra.mxu1 %v594_v10 }
  0xac   : > { %v327_v12 = vpop.f32.mrf.mxu0 }
  0xad   : > { %v328_v13 = vadd.f32 %v687_v11, %v327_v12 }
  0xaf   : > { %v331_v14 = vmax.f32 %v328_v13, 0.0 }
  0xb1   : > { %v332_v15 = vpack.c.bf16 %v331_v14, %v331_v14 }
  0xb3   : > { %409 = vmatmul.bf16.vlgmr.msra.gmra.mxu1 %v332_v15 }
  0xb4   : > { %v329_v16 = vpop.f32.mrf.mxu0 }
 0x130   : > { %v410_v18 = vpop.f32.mrf.mxu1 }
 0x131   : > { %v411_v19 = vadd.f32 %v688_v17, %v410_v18 }
 0x133   : > { %v414_v20 = vpack.c.bf16 %v411_v19, %v411_v19 }
 0x135   : > { %415 = vst [vmem:[%s291_s12] sm:$0xf] %v414_v20 }
 0x136   : > { %806 = shalt.err (!%p803_p13)
}
 0x137   : > { %612 = dma.vmem_to_hbm [thread:$0]  (%p975_p0), %s432_s13, 64, %s434_s15, %s417_s21  }
 0x138   : > { %v412_v21 = vpop.f32.mrf.mxu1 }
 0x139 PF: > { %s445_s16 = sand.u32 1, %s845_s18   ;;  %p626_p2 = pnand %p539_p6, %p982_p5 }
 0x13a   : > { %s446_s8 = scalar_lea.sflag [#allocation4], %s445_s16 }
 0x13b   : > { %p627_p4 = pneg %p626_p2 }
 0x13d   : > { %840 = dma.done.wait (%p627_p4), %s446_s8, 64  }
 0x13e   : > { %842 = vsyncadd (%p627_p4), %s446_s8, 4294967232  ;;  %s22_s23 = sadd.s32 1, %s865_s23   ;;  %s1066_s18 = smov %s849_s19 }
 0x13f   : > { %p19_p7 = scmp.ge.s32.totalorder %s22_s23, 4   ;;  %s1067_s19 = smov %s853_s20 }
 0x140   : > { %s1068_s20 = smov %s980_s28  ;;  %s1069_s21 = smov %s861_s22 }
 0x141   : > { %s1070_s22 = smov %s1072_s14  ;;  %21 = sbr.rel (!%p19_p7) target bundleno = 7 (0x7), region = 93 }
 0x146   :  { %452 = vsyncpa [#allocation3], 1 }
 0x147   :  { %454 = vsyncpa [#allocation3 + $0x1], 1 }
 0x148   :  { %455 = vsyncpa [#allocation6], 1 }
 0x149   :  { %456 = vsyncpa [#allocation4], 1 }
 0x14a   :  { %458 = vsyncpa [#allocation4 + $0x1], 1 }

</bundles_post_ra>
